<compile_context>
chip_gen: v6e
topology: v6e:2x2x1
jax: 0.10.0
libtpu: 0.0.40
codegen_flags: <defaults>
</compile_context>

<pallas_src>
import math

import jax
import jax.numpy as jnp
from jax.experimental import pallas as pl
from jax.experimental.pallas import tpu as pltpu


# ----------------------------- configuration -----------------------------
INPUT_DIM = 256
Z_DIM = 16
ENCODE_LAYERS = [128, 128, 256]   # scaled-down [500, 500, 2000]
DECODE_LAYERS = [256, 128, 128]   # scaled-down [2000, 500, 500]
BATCH = 8
BINARY = True                     # final sigmoid activation

LANE = 128


def _round_up(n, m):
    return ((n + m - 1) // m) * m


# Packed-bias layout: each layer's bias occupies a 128-lane-aligned slot so
# in-kernel slices never cross lanes at unaligned offsets.
_BIAS_ORDER = [
    ("enc0", ENCODE_LAYERS[0]),
    ("enc1", ENCODE_LAYERS[1]),
    ("enc2", ENCODE_LAYERS[2]),
    ("heads", 2 * Z_DIM),          # fused mu | logvar bias
    ("dec0", DECODE_LAYERS[0]),
    ("dec1", DECODE_LAYERS[1]),
    ("dec2", DECODE_LAYERS[2]),
    ("out", INPUT_DIM),
]
_BIAS_OFFSETS = {}
_off = 0
for _name, _w in _BIAS_ORDER:
    _BIAS_OFFSETS[_name] = (_off, _w)
    _off += _round_up(_w, LANE)
BIAS_PACK_WIDTH = _off            # = 1280


# ------------------------------- kernel ----------------------------------
def vade_forward_kernel(
    x_ref,                                   # [TB, INPUT_DIM] f32 batch tile
    ew0_ref, ew1_ref, ew2_ref,               # encoder weights, bf16, [in, out]
    hw_ref,                                  # fused mu|logvar head weight [enc_last, 2*Z_DIM]
    dw0_ref, dw1_ref, dw2_ref,               # decoder weights, bf16
    ow_ref,                                  # reconstruction weight, bf16
    bias_ref,                                # packed biases, f32 [1, BIAS_PACK_WIDTH]
    recon_ref,                               # [TB, INPUT_DIM] f32
    latent_ref,                              # [TB, 2*Z_DIM]   f32  (mu | logvar)
):
    def linear(h, w_ref, bias_name):
        off, width = _BIAS_OFFSETS[bias_name]          # static, 128-aligned
        b = bias_ref[:, off:off + width]
        return jnp.dot(h.astype(jnp.bfloat16), w_ref[...],
                       preferred_element_type=jnp.float32) + b

    x = x_ref[...]

    # ---- encoder MLP (Linear + ReLU) x3 ----
    h = jnp.maximum(linear(x, ew0_ref, "enc0"), 0.0)
    h = jnp.maximum(linear(h, ew1_ref, "enc1"), 0.0)
    h = jnp.maximum(linear(h, ew2_ref, "enc2"), 0.0)

    # ---- fused latent heads: one [enc_last, 2*Z_DIM] matmul ----
    ml = linear(h, hw_ref, "heads")                    # [TB, 2*Z_DIM] = mu | logvar
    z = ml[:, :Z_DIM]                                  # eval-mode reparameterize: z = mu

    # ---- decoder MLP (Linear + ReLU) x3 ----
    d = jnp.maximum(linear(z, dw0_ref, "dec0"), 0.0)
    d = jnp.maximum(linear(d, dw1_ref, "dec1"), 0.0)
    d = jnp.maximum(linear(d, dw2_ref, "dec2"), 0.0)

    # ---- reconstruction + sigmoid (binary=True) ----
    logits = linear(d, ow_ref, "out")
    recon = jax.nn.sigmoid(logits) if BINARY else logits

    recon_ref[...] = recon.astype(recon_ref.dtype)
    latent_ref[...] = ml.astype(latent_ref.dtype)


# ------------------------------- wrapper ----------------------------------
def vade_forward(x, params, *, batch_tile=None):
    """x: [B, INPUT_DIM] float32. params: dict of (weight[in,out] f32, bias[1,out] f32).

    Returns (z, recon_x, mu, logvar) with z == mu (eval mode).
    """
    B = x.shape[0]
    if batch_tile is None:
        # bf16 activations pack 16 rows per vreg sublane group; keep TB a
        # multiple of 16, cap at 128 for good MXU M-fill without over-padding
        # tiny demo batches.
        batch_tile = 128 if B >= 128 else max(16, _round_up(B, 16))
    TB = batch_tile
    B_pad = _round_up(B, TB)

    x = x.astype(jnp.float32)
    if B_pad != B:
        x = jnp.pad(x, ((0, B_pad - B), (0, 0)))

    # --- weights: bf16, already [in, out]; mu/logvar fused into one head ---
    def w_bf16(name):
        return params[name][0].astype(jnp.bfloat16)

    head_w = jnp.concatenate(
        [params["mu"][0], params["logvar"][0]], axis=1).astype(jnp.bfloat16)

    weights = [w_bf16("enc0"), w_bf16("enc1"), w_bf16("enc2"), head_w,
               w_bf16("dec0"), w_bf16("dec1"), w_bf16("dec2"), w_bf16("out")]

    # --- pack all biases (kept f32 for accumulation precision) into one slab ---
    bias_pack = jnp.zeros((1, BIAS_PACK_WIDTH), jnp.float32)

    def set_bias(pack, name, b):
        off, width = _BIAS_OFFSETS[name]
        return pack.at[:, off:off + width].set(b.astype(jnp.float32))

    bias_pack = set_bias(bias_pack, "enc0", params["enc0"][1])
    bias_pack = set_bias(bias_pack, "enc1", params["enc1"][1])
    bias_pack = set_bias(bias_pack, "enc2", params["enc2"][1])
    bias_pack = set_bias(
        bias_pack, "heads",
        jnp.concatenate([params["mu"][1], params["logvar"][1]], axis=1))
    bias_pack = set_bias(bias_pack, "dec0", params["dec0"][1])
    bias_pack = set_bias(bias_pack, "dec1", params["dec1"][1])
    bias_pack = set_bias(bias_pack, "dec2", params["dec2"][1])
    bias_pack = set_bias(bias_pack, "out", params["out"][1])

    grid = (B_pad // TB,)

    def resident(arr):
        # Constant block index -> fetched once, stays in VMEM across batch tiles.
        return pl.BlockSpec(arr.shape, lambda i: (0, 0))

    in_specs = (
        [pl.BlockSpec((TB, INPUT_DIM), lambda i: (i, 0))]    # x: batch-tiled
        + [resident(w) for w in weights]
        + [resident(bias_pack)]
    )
    out_specs = (
        pl.BlockSpec((TB, INPUT_DIM), lambda i: (i, 0)),     # recon
        pl.BlockSpec((TB, 2 * Z_DIM), lambda i: (i, 0)),     # mu | logvar slab
    )
    out_shapes = (
        jax.ShapeDtypeStruct((B_pad, INPUT_DIM), jnp.float32),
        jax.ShapeDtypeStruct((B_pad, 2 * Z_DIM), jnp.float32),
    )

    recon, latent = pl.pallas_call(
        vade_forward_kernel,
        grid=grid,
        out_shape=out_shapes,
        in_specs=in_specs,
        out_specs=out_specs,
        compiler_params=pltpu.CompilerParams(
            dimension_semantics=("parallel",)),   # shards batch tiles across TCs (v7x)
    )(x, *weights, bias_pack)

    recon = recon[:B]
    mu = latent[:B, :Z_DIM]
    logvar = latent[:B, Z_DIM:]
    z = mu                     # eval-mode reparameterize returns mu
    return z, recon, mu, logvar


# ------------------------- deterministic init -----------------------------
def init_linear(key, fan_in, fan_out):
    """PyTorch-style uniform(-1/sqrt(fan_in), 1/sqrt(fan_in)); weight stored [in, out]."""
    kw, kb = jax.random.split(key)
    bound = 1.0 / math.sqrt(fan_in)
    w = jax.random.uniform(kw, (fan_in, fan_out), jnp.float32, -bound, bound)
    b = jax.random.uniform(kb, (1, fan_out), jnp.float32, -bound, bound)
    return w, b


def init_params(key):
    dims_enc = [INPUT_DIM] + ENCODE_LAYERS
    dims_dec = [Z_DIM] + DECODE_LAYERS
    keys = jax.random.split(key, 16)
    params = {}
    params["enc0"] = init_linear(keys[0], dims_enc[0], dims_enc[1])
    params["enc1"] = init_linear(keys[1], dims_enc[1], dims_enc[2])
    params["enc2"] = init_linear(keys[2], dims_enc[2], dims_enc[3])
    params["mu"] = init_linear(keys[3], ENCODE_LAYERS[-1], Z_DIM)
    params["logvar"] = init_linear(keys[4], ENCODE_LAYERS[-1], Z_DIM)
    params["dec0"] = init_linear(keys[5], dims_dec[0], dims_dec[1])
    params["dec1"] = init_linear(keys[6], dims_dec[1], dims_dec[2])
    params["dec2"] = init_linear(keys[7], dims_dec[2], dims_dec[3])
    params["out"] = init_linear(keys[8], DECODE_LAYERS[-1], INPUT_DIM)
    # GMM parameters (theta_p, u_p, lambda_p) are not used in forward(); they
    # only enter get_gamma / loss_function.
    return params


# -------------------------- pure-JAX reference -----------------------------
def vade_forward_ref(x, params):
    """Reference with matching bf16-weight / f32-accumulate matmul semantics."""
    def lin(inp, p):
        w, b = p
        return jnp.dot(inp.astype(jnp.bfloat16), w.astype(jnp.bfloat16),
                       preferred_element_type=jnp.float32) + b

    h = jax.nn.relu(lin(x, params["enc0"]))
    h = jax.nn.relu(lin(h, params["enc1"]))
    h = jax.nn.relu(lin(h, params["enc2"]))
    mu = lin(h, params["mu"])
    logvar = lin(h, params["logvar"])
    z = mu
    d = jax.nn.relu(lin(z, params["dec0"]))
    d = jax.nn.relu(lin(d, params["dec1"]))
    d = jax.nn.relu(lin(d, params["dec2"]))
    recon = jax.nn.sigmoid(lin(d, params["out"]))
    return z, recon, mu, logvar


# --------------------------------- main ------------------------------------
if __name__ == "__main__":
    key = jax.random.PRNGKey(0)
    kx, kp = jax.random.split(key)
    x = jax.random.uniform(kx, (BATCH, INPUT_DIM), jnp.float32)  # "binary" data in [0,1]
    params = init_params(kp)

    z, recon, mu, logvar = vade_forward(x, params)
    jax.block_until_ready((z, recon, mu, logvar))

    # sanity check vs pure-JAX reference (same bf16/f32-acc matmul precision)
    z_r, recon_r, mu_r, logvar_r = vade_forward_ref(x, params)
    assert jnp.allclose(z, z_r, atol=1e-2, rtol=1e-2), "z mismatch"
    assert jnp.allclose(recon, recon_r, atol=1e-2, rtol=1e-2), "recon mismatch"
    assert jnp.allclose(mu, mu_r, atol=1e-2, rtol=1e-2), "mu mismatch"
    assert jnp.allclose(logvar, logvar_r, atol=1e-2, rtol=1e-2), "logvar mismatch"

    print("KERNEL_OK")
</pallas_src>

<mosaic_0001>
module attributes {stable_mosaic.version = 11 : i64} {
  func.func @vade_forward_kernel(%arg0: i32, %arg1: memref<16x256xf32, #tpu.memory_space<vmem>>, %arg2: memref<256x128xbf16, #tpu.memory_space<vmem>>, %arg3: memref<128x128xbf16, #tpu.memory_space<vmem>>, %arg4: memref<128x256xbf16, #tpu.memory_space<vmem>>, %arg5: memref<256x32xbf16, #tpu.memory_space<vmem>>, %arg6: memref<16x256xbf16, #tpu.memory_space<vmem>>, %arg7: memref<256x128xbf16, #tpu.memory_space<vmem>>, %arg8: memref<128x128xbf16, #tpu.memory_space<vmem>>, %arg9: memref<128x256xbf16, #tpu.memory_space<vmem>>, %arg10: memref<1x1408xf32, #tpu.memory_space<vmem>>, %arg11: memref<16x256xf32, #tpu.memory_space<vmem>>, %arg12: memref<16x32xf32, #tpu.memory_space<vmem>>) attributes {dimension_semantics = [#tpu.dimension_semantics<parallel>], iteration_bounds = array<i64: 1>, scalar_prefetch = 0 : i64, scratch_operands = 0 : i64, tpu.core_type = #tpu.core_type<tc>, window_params = [{transform_indices = @transform_0, window_bounds = array<i64: 16, 256>}, {pipeline_mode = #tpu.pipeline_mode<synchronous>, transform_indices = @transform_1, window_bounds = array<i64: 256, 128>}, {pipeline_mode = #tpu.pipeline_mode<synchronous>, transform_indices = @transform_2, window_bounds = array<i64: 128, 128>}, {pipeline_mode = #tpu.pipeline_mode<synchronous>, transform_indices = @transform_3, window_bounds = array<i64: 128, 256>}, {pipeline_mode = #tpu.pipeline_mode<synchronous>, transform_indices = @transform_4, window_bounds = array<i64: 256, 32>}, {pipeline_mode = #tpu.pipeline_mode<synchronous>, transform_indices = @transform_5, window_bounds = array<i64: 16, 256>}, {pipeline_mode = #tpu.pipeline_mode<synchronous>, transform_indices = @transform_6, window_bounds = array<i64: 256, 128>}, {pipeline_mode = #tpu.pipeline_mode<synchronous>, transform_indices = @transform_7, window_bounds = array<i64: 128, 128>}, {pipeline_mode = #tpu.pipeline_mode<synchronous>, transform_indices = @transform_8, window_bounds = array<i64: 128, 256>}, {pipeline_mode = #tpu.pipeline_mode<synchronous>, transform_indices = @transform_9, window_bounds = array<i64: 1, 1408>}, {transform_indices = @transform_10, window_bounds = array<i64: 16, 256>}, {transform_indices = @transform_11, window_bounds = array<i64: 16, 32>}]} {
    %c0 = arith.constant 0 : index
    %c0_0 = arith.constant 0 : index
    %0 = vector.load %arg1[%c0, %c0_0] : memref<16x256xf32, #tpu.memory_space<vmem>>, vector<16x256xf32>
    %c0_1 = arith.constant 0 : index
    %c0_2 = arith.constant 0 : index
    %1 = vector.load %arg10[%c0_1, %c0_2] : memref<1x1408xf32, #tpu.memory_space<vmem>>, vector<1x128xf32>
    %2 = arith.truncf %0 : vector<16x256xf32> to vector<16x256xbf16>
    %c0_3 = arith.constant 0 : index
    %c0_4 = arith.constant 0 : index
    %3 = vector.load %arg2[%c0_3, %c0_4] : memref<256x128xbf16, #tpu.memory_space<vmem>>, vector<256x128xbf16>
    %cst = arith.constant dense<0.000000e+00> : vector<16x128xf32>
    %4 = tpu.matmul %2, %3, %cst {dimension_numbers = #tpu.dot_dimension_numbers<[1], [0], [0], [1], [0, 0, 1, 1], [], []>} : vector<16x256xbf16>, vector<256x128xbf16>, vector<16x128xf32> -> vector<16x128xf32>
    %5 = vector.broadcast %1 : vector<1x128xf32> to vector<16x128xf32>
    %6 = arith.addf %4, %5 : vector<16x128xf32>
    %cst_5 = arith.constant 0.000000e+00 : f32
    %7 = vector.broadcast %cst_5 : f32 to vector<16x128xf32>
    %8 = arith.maximumf %6, %7 : vector<16x128xf32>
    %c0_6 = arith.constant 0 : index
    %c128 = arith.constant 128 : index
    %9 = vector.load %arg10[%c0_6, %c128] : memref<1x1408xf32, #tpu.memory_space<vmem>>, vector<1x128xf32>
    %10 = arith.truncf %8 : vector<16x128xf32> to vector<16x128xbf16>
    %c0_7 = arith.constant 0 : index
    %c0_8 = arith.constant 0 : index
    %11 = vector.load %arg3[%c0_7, %c0_8] : memref<128x128xbf16, #tpu.memory_space<vmem>>, vector<128x128xbf16>
    %cst_9 = arith.constant dense<0.000000e+00> : vector<16x128xf32>
    %12 = tpu.matmul %10, %11, %cst_9 {dimension_numbers = #tpu.dot_dimension_numbers<[1], [0], [0], [1], [0, 0, 1, 1], [], []>} : vector<16x128xbf16>, vector<128x128xbf16>, vector<16x128xf32> -> vector<16x128xf32>
    %13 = vector.broadcast %9 : vector<1x128xf32> to vector<16x128xf32>
    %14 = arith.addf %12, %13 : vector<16x128xf32>
    %cst_10 = arith.constant 0.000000e+00 : f32
    %15 = vector.broadcast %cst_10 : f32 to vector<16x128xf32>
    %16 = arith.maximumf %14, %15 : vector<16x128xf32>
    %c0_11 = arith.constant 0 : index
    %c256 = arith.constant 256 : index
    %17 = vector.load %arg10[%c0_11, %c256] : memref<1x1408xf32, #tpu.memory_space<vmem>>, vector<1x256xf32>
    %18 = arith.truncf %16 : vector<16x128xf32> to vector<16x128xbf16>
    %c0_12 = arith.constant 0 : index
    %c0_13 = arith.constant 0 : index
    %19 = vector.load %arg4[%c0_12, %c0_13] : memref<128x256xbf16, #tpu.memory_space<vmem>>, vector<128x256xbf16>
    %cst_14 = arith.constant dense<0.000000e+00> : vector<16x256xf32>
    %20 = tpu.matmul %18, %19, %cst_14 {dimension_numbers = #tpu.dot_dimension_numbers<[1], [0], [0], [1], [0, 0, 1, 1], [], []>} : vector<16x128xbf16>, vector<128x256xbf16>, vector<16x256xf32> -> vector<16x256xf32>
    %21 = vector.broadcast %17 : vector<1x256xf32> to vector<16x256xf32>
    %22 = arith.addf %20, %21 : vector<16x256xf32>
    %cst_15 = arith.constant 0.000000e+00 : f32
    %23 = vector.broadcast %cst_15 : f32 to vector<16x256xf32>
    %24 = arith.maximumf %22, %23 : vector<16x256xf32>
    %c0_16 = arith.constant 0 : index
    %c512 = arith.constant 512 : index
    %25 = vector.load %arg10[%c0_16, %c512] : memref<1x1408xf32, #tpu.memory_space<vmem>>, vector<1x32xf32>
    %26 = arith.truncf %24 : vector<16x256xf32> to vector<16x256xbf16>
    %c0_17 = arith.constant 0 : index
    %c0_18 = arith.constant 0 : index
    %27 = vector.load %arg5[%c0_17, %c0_18] : memref<256x32xbf16, #tpu.memory_space<vmem>>, vector<256x32xbf16>
    %cst_19 = arith.constant dense<0.000000e+00> : vector<16x32xf32>
    %28 = tpu.matmul %26, %27, %cst_19 {dimension_numbers = #tpu.dot_dimension_numbers<[1], [0], [0], [1], [0, 0, 1, 1], [], []>} : vector<16x256xbf16>, vector<256x32xbf16>, vector<16x32xf32> -> vector<16x32xf32>
    %29 = vector.broadcast %25 : vector<1x32xf32> to vector<16x32xf32>
    %30 = arith.addf %28, %29 : vector<16x32xf32>
    %31 = vector.extract_strided_slice %30 {offsets = [0, 0], sizes = [16, 16], strides = [1, 1]} : vector<16x32xf32> to vector<16x16xf32>
    %c0_20 = arith.constant 0 : index
    %c640 = arith.constant 640 : index
    %32 = vector.load %arg10[%c0_20, %c640] : memref<1x1408xf32, #tpu.memory_space<vmem>>, vector<1x256xf32>
    %33 = arith.truncf %31 : vector<16x16xf32> to vector<16x16xbf16>
    %c0_21 = arith.constant 0 : index
    %c0_22 = arith.constant 0 : index
    %34 = vector.load %arg6[%c0_21, %c0_22] : memref<16x256xbf16, #tpu.memory_space<vmem>>, vector<16x256xbf16>
    %cst_23 = arith.constant dense<0.000000e+00> : vector<16x256xf32>
    %35 = tpu.matmul %33, %34, %cst_23 {dimension_numbers = #tpu.dot_dimension_numbers<[1], [0], [0], [1], [0, 0, 1, 1], [], []>} : vector<16x16xbf16>, vector<16x256xbf16>, vector<16x256xf32> -> vector<16x256xf32>
    %36 = vector.broadcast %32 : vector<1x256xf32> to vector<16x256xf32>
    %37 = arith.addf %35, %36 : vector<16x256xf32>
    %cst_24 = arith.constant 0.000000e+00 : f32
    %38 = vector.broadcast %cst_24 : f32 to vector<16x256xf32>
    %39 = arith.maximumf %37, %38 : vector<16x256xf32>
    %c0_25 = arith.constant 0 : index
    %c896 = arith.constant 896 : index
    %40 = vector.load %arg10[%c0_25, %c896] : memref<1x1408xf32, #tpu.memory_space<vmem>>, vector<1x128xf32>
    %41 = arith.truncf %39 : vector<16x256xf32> to vector<16x256xbf16>
    %c0_26 = arith.constant 0 : index
    %c0_27 = arith.constant 0 : index
    %42 = vector.load %arg7[%c0_26, %c0_27] : memref<256x128xbf16, #tpu.memory_space<vmem>>, vector<256x128xbf16>
    %cst_28 = arith.constant dense<0.000000e+00> : vector<16x128xf32>
    %43 = tpu.matmul %41, %42, %cst_28 {dimension_numbers = #tpu.dot_dimension_numbers<[1], [0], [0], [1], [0, 0, 1, 1], [], []>} : vector<16x256xbf16>, vector<256x128xbf16>, vector<16x128xf32> -> vector<16x128xf32>
    %44 = vector.broadcast %40 : vector<1x128xf32> to vector<16x128xf32>
    %45 = arith.addf %43, %44 : vector<16x128xf32>
    %cst_29 = arith.constant 0.000000e+00 : f32
    %46 = vector.broadcast %cst_29 : f32 to vector<16x128xf32>
    %47 = arith.maximumf %45, %46 : vector<16x128xf32>
    %c0_30 = arith.constant 0 : index
    %c1024 = arith.constant 1024 : index
    %48 = vector.load %arg10[%c0_30, %c1024] : memref<1x1408xf32, #tpu.memory_space<vmem>>, vector<1x128xf32>
    %49 = arith.truncf %47 : vector<16x128xf32> to vector<16x128xbf16>
    %c0_31 = arith.constant 0 : index
    %c0_32 = arith.constant 0 : index
    %50 = vector.load %arg8[%c0_31, %c0_32] : memref<128x128xbf16, #tpu.memory_space<vmem>>, vector<128x128xbf16>
    %cst_33 = arith.constant dense<0.000000e+00> : vector<16x128xf32>
    %51 = tpu.matmul %49, %50, %cst_33 {dimension_numbers = #tpu.dot_dimension_numbers<[1], [0], [0], [1], [0, 0, 1, 1], [], []>} : vector<16x128xbf16>, vector<128x128xbf16>, vector<16x128xf32> -> vector<16x128xf32>
    %52 = vector.broadcast %48 : vector<1x128xf32> to vector<16x128xf32>
    %53 = arith.addf %51, %52 : vector<16x128xf32>
    %cst_34 = arith.constant 0.000000e+00 : f32
    %54 = vector.broadcast %cst_34 : f32 to vector<16x128xf32>
    %55 = arith.maximumf %53, %54 : vector<16x128xf32>
    %c0_35 = arith.constant 0 : index
    %c1152 = arith.constant 1152 : index
    %56 = vector.load %arg10[%c0_35, %c1152] : memref<1x1408xf32, #tpu.memory_space<vmem>>, vector<1x256xf32>
    %57 = arith.truncf %55 : vector<16x128xf32> to vector<16x128xbf16>
    %c0_36 = arith.constant 0 : index
    %c0_37 = arith.constant 0 : index
    %58 = vector.load %arg9[%c0_36, %c0_37] : memref<128x256xbf16, #tpu.memory_space<vmem>>, vector<128x256xbf16>
    %cst_38 = arith.constant dense<0.000000e+00> : vector<16x256xf32>
    %59 = tpu.matmul %57, %58, %cst_38 {dimension_numbers = #tpu.dot_dimension_numbers<[1], [0], [0], [1], [0, 0, 1, 1], [], []>} : vector<16x128xbf16>, vector<128x256xbf16>, vector<16x256xf32> -> vector<16x256xf32>
    %60 = vector.broadcast %56 : vector<1x256xf32> to vector<16x256xf32>
    %61 = arith.addf %59, %60 : vector<16x256xf32>
    %62 = arith.negf %61 : vector<16x256xf32>
    %63 = math.exp %62 : vector<16x256xf32>
    %cst_39 = arith.constant 1.000000e+00 : f32
    %64 = vector.broadcast %cst_39 : f32 to vector<16x256xf32>
    %65 = arith.addf %64, %63 : vector<16x256xf32>
    %66 = arith.divf %64, %65 : vector<16x256xf32>
    %c0_40 = arith.constant 0 : index
    %c0_41 = arith.constant 0 : index
    %67 = vector.load %arg11[%c0_40, %c0_41] : memref<16x256xf32, #tpu.memory_space<vmem>>, vector<16x256xf32>
    tpu.vector_store %arg11[%c0_40, %c0_41], %66 {strides = array<i32>} : memref<16x256xf32, #tpu.memory_space<vmem>>, vector<16x256xf32>,
    %c0_42 = arith.constant 0 : index
    %c0_43 = arith.constant 0 : index
    %68 = vector.load %arg12[%c0_42, %c0_43] : memref<16x32xf32, #tpu.memory_space<vmem>>, vector<16x32xf32>
    tpu.vector_store %arg12[%c0_42, %c0_43], %30 {strides = array<i32>} : memref<16x32xf32, #tpu.memory_space<vmem>>, vector<16x32xf32>,
    return
  }
  func.func @transform_0(%arg0: i32) -> (i32, i32) {
    %c0_i32 = arith.constant 0 : i32
    %c0_i32_0 = arith.constant 0 : i32
    return %arg0, %c0_i32 : i32, i32
  }
  func.func @transform_1(%arg0: i32) -> (i32, i32) {
    %c0_i32 = arith.constant 0 : i32
    %c0_i32_0 = arith.constant 0 : i32
    %c0_i32_1 = arith.constant 0 : i32
    return %c0_i32, %c0_i32_0 : i32, i32
  }
  func.func @transform_2(%arg0: i32) -> (i32, i32) {
    %c0_i32 = arith.constant 0 : i32
    %c0_i32_0 = arith.constant 0 : i32
    %c0_i32_1 = arith.constant 0 : i32
    return %c0_i32, %c0_i32_0 : i32, i32
  }
  func.func @transform_3(%arg0: i32) -> (i32, i32) {
    %c0_i32 = arith.constant 0 : i32
    %c0_i32_0 = arith.constant 0 : i32
    %c0_i32_1 = arith.constant 0 : i32
    return %c0_i32, %c0_i32_0 : i32, i32
  }
  func.func @transform_4(%arg0: i32) -> (i32, i32) {
    %c0_i32 = arith.constant 0 : i32
    %c0_i32_0 = arith.constant 0 : i32
    %c0_i32_1 = arith.constant 0 : i32
    return %c0_i32, %c0_i32_0 : i32, i32
  }
  func.func @transform_5(%arg0: i32) -> (i32, i32) {
    %c0_i32 = arith.constant 0 : i32
    %c0_i32_0 = arith.constant 0 : i32
    %c0_i32_1 = arith.constant 0 : i32
    return %c0_i32, %c0_i32_0 : i32, i32
  }
  func.func @transform_6(%arg0: i32) -> (i32, i32) {
    %c0_i32 = arith.constant 0 : i32
    %c0_i32_0 = arith.constant 0 : i32
    %c0_i32_1 = arith.constant 0 : i32
    return %c0_i32, %c0_i32_0 : i32, i32
  }
  func.func @transform_7(%arg0: i32) -> (i32, i32) {
    %c0_i32 = arith.constant 0 : i32
    %c0_i32_0 = arith.constant 0 : i32
    %c0_i32_1 = arith.constant 0 : i32
    return %c0_i32, %c0_i32_0 : i32, i32
  }
  func.func @transform_8(%arg0: i32) -> (i32, i32) {
    %c0_i32 = arith.constant 0 : i32
    %c0_i32_0 = arith.constant 0 : i32
    %c0_i32_1 = arith.constant 0 : i32
    return %c0_i32, %c0_i32_0 : i32, i32
  }
  func.func @transform_9(%arg0: i32) -> (i32, i32) {
    %c0_i32 = arith.constant 0 : i32
    %c0_i32_0 = arith.constant 0 : i32
    %c0_i32_1 = arith.constant 0 : i32
    return %c0_i32, %c0_i32_0 : i32, i32
  }
  func.func @transform_10(%arg0: i32) -> (i32, i32) {
    %c0_i32 = arith.constant 0 : i32
    %c0_i32_0 = arith.constant 0 : i32
    return %arg0, %c0_i32 : i32, i32
  }
  func.func @transform_11(%arg0: i32) -> (i32, i32) {
    %c0_i32 = arith.constant 0 : i32
    %c0_i32_0 = arith.constant 0 : i32
    return %arg0, %c0_i32 : i32, i32
  }
}

</mosaic_0001>

<bundles_post_ra>
// kernel: tpu_custom_call.1
= control target key start
LH: loop header
LB: loop body
LE: loop exit
PB: predicated region body
PF: predicated region fallthrough
CT: control target
= control target key end

     0   :  { %17 = vsyncpa [#allocation3], 0  ;;  %s2184_s0 = inlined_call_operand.vmem [shape: f32[16,256], index: 0, kind: input, shape index: {}]   ;;  %s2185_s1 = inlined_call_operand.vmem [shape: bf16[256,128], index: 1, kind: input, shape index: {}]   ;;  %s2186_s2 = inlined_call_operand.hbm [shape: bf16[128,128], index: 2, kind: input, shape index: {}]   ;;  %s2187_s3 = inlined_call_operand.hbm [shape: bf16[128,256], index: 3, kind: input, shape index: {}]   ;;  %s2188_s4 = inlined_call_operand.vmem [shape: bf16[256,32], index: 4, kind: input, shape index: {}]   ;;  %s2189_s5 = inlined_call_operand.hbm [shape: bf16[16,256], index: 5, kind: input, shape index: {}]   ;;  %s2190_s6 = inlined_call_operand.hbm [shape: bf16[256,128], index: 6, kind: input, shape index: {}]   ;;  %s2191_s7 = inlined_call_operand.hbm [shape: bf16[128,128], index: 7, kind: input, shape index: {}]   ;;  %s2192_s8 = inlined_call_operand.hbm [shape: bf16[128,256], index: 8, kind: input, shape index: {}]   ;;  %s2193_s9 = inlined_call_operand.vmem [shape: f32[1,1408], index: 9, kind: input, shape index: {}]   ;;  %s2194_s10 = inlined_call_operand.hbm [shape: f32[16,256], index: 10, kind: output, shape index: {0}]   ;;  %s2195_s11 = inlined_call_operand.hbm [shape: f32[16,32], index: 11, kind: output, shape index: {1}]  }
   0x1   :  { %18 = vsyncpa [#allocation6], 0 }
   0x2   :  { %19 = vsyncpa [#allocation9], 0 }
   0x3   :  { %20 = vsyncpa [#allocation12], 0 }
   0x4   :  { %21 = vsyncpa [#allocation4], 0 }
   0x5   :  { %22 = vsyncpa [#allocation15], 0  ;;  %s1897_s17 = smov [#allocation5]  }
   0x6   :  { %s44_s18 = sshll.u32 %s1897_s17, 4  ;;  %s45_s18 = int_to_ptr.vmem [resolvable:$true] %s44_s18 }
   0x7   :  { %s1733_s19 = scalar_lea.vmem %s45_s18, 2048  ;;  %p1738_p1 = scmp.lt.s32.totalorder %s45_s18, %s45_s18 }
   0x8   :  { %p1734_p0 = scmp.ne.s32.totalorder %s45_s18, %s1733_s19  ;;  %p1739_p2 = scmp.lt.s32.totalorder %s1733_s19, %s1733_s19 }
   0xa   :  { %p1740_p3 = por %p1739_p2, %p1738_p1 }
   0xc   :  { %p1741_p4 = pnand %p1740_p3, %p1734_p0 }
   0xe   :  { %1744 = shalt.err (!%p1741_p4)
}
   0xf   :  { %s1898_s20 = smov 128   ;;  %s1899_s21 = smov 8  }
  0x10   :  { %50 = dma.hbm_to_vmem [thread:$0]  %s2187_s3, 2048, %s45_s18, [#allocation6], %s1898_s20, %s1898_s20, %s1899_s21  }
  0x11   :  { %s1900_s24 = smov [#allocation8]   ;;  %s1901_s26 = smov [#allocation2]  }
  0x12   :  { %s70_s25 = sshll.u32 %s1900_s24, 4  ;;  %s32_s27 = sshll.u32 %s1901_s26, 4  ;;  %s71_s25 = int_to_ptr.vmem [resolvable:$true] %s70_s25  ;;  %s33_s27 = int_to_ptr.vmem [resolvable:$true] %s32_s27 }
  0x13   :  { %s1753_s28 = scalar_lea.vmem %s71_s25, 2048  ;;  %p1758_p6 = scmp.lt.s32.totalorder %s71_s25, %s71_s25 }
  0x14   :  { %p1754_p5 = scmp.ne.s32.totalorder %s71_s25, %s1753_s28  ;;  %p1759_p7 = scmp.lt.s32.totalorder %s1753_s28, %s1753_s28 }
  0x16   :  { %p1760_p8 = por %p1759_p7, %p1758_p6 }
  0x18   :  { %p1761_p9 = pnand %p1760_p8, %p1754_p5 }
  0x1a   :  { %1764 = shalt.err (!%p1761_p9)
}
  0x1b   :  { %s1902_s29 = smov 64   ;;  %s1903_s30 = smov 4  }
  0x1c   :  { %76 = dma.hbm_to_vmem [thread:$0]  %s2190_s6, 2048, %s71_s25, [#allocation9], %s1902_s29, %s1902_s29, %s1903_s30  }
  0x1d   :  { %s1773_s3 = scalar_lea.vmem %s33_s27, 1024  ;;  %p1778_p11 = scmp.lt.s32.totalorder %s33_s27, %s33_s27 }
  0x1e   :  { %p1774_p10 = scmp.ne.s32.totalorder %s33_s27, %s1773_s3  ;;  %p1779_p12 = scmp.lt.s32.totalorder %s1773_s3, %s1773_s3 }
  0x20   :  { %p1780_p13 = por %p1779_p12, %p1778_p11 }
  0x22   :  { %p1781_p0 = pnand %p1780_p13, %p1774_p10 }
  0x24   :  { %1784 = shalt.err (!%p1781_p0)
}
  0x25   :  { %38 = dma.hbm_to_vmem [thread:$0]  %s2186_s2, 1024, %s33_s27, [#allocation3], %s1902_s29, %s1902_s29, %s1903_s30  }
  0x26   :  { %s1904_s16 = smov [#allocation7]   ;;  %s1905_s18 = smov [#allocation10]  }
  0x27   :  { %s58_s17 = sshll.u32 %s1904_s16, 4  ;;  %s82_s6 = sshll.u32 %s1905_s18, 4  ;;  %s59_s17 = int_to_ptr.vmem [resolvable:$true] %s58_s17  ;;  %s83_s6 = int_to_ptr.vmem [resolvable:$true] %s82_s6 }
  0x28   :  { %s1793_s19 = scalar_lea.vmem %s59_s17, 256  ;;  %p1798_p2 = scmp.lt.s32.totalorder %s59_s17, %s59_s17 }
  0x29   :  { %p1794_p1 = scmp.ne.s32.totalorder %s59_s17, %s1793_s19  ;;  %p1799_p3 = scmp.lt.s32.totalorder %s1793_s19, %s1793_s19 }
  0x2b   :  { %p1800_p4 = por %p1799_p3, %p1798_p2 }
  0x2d   :  { %p1801_p5 = pnand %p1800_p4, %p1794_p1 }
  0x2f   :  { %1804 = shalt.err (!%p1801_p5)
}
  0x30   :  { %64 = dma.hbm_to_vmem [thread:$0]  %s2189_s5, 256, %s59_s17, [#allocation6], %s1898_s20, %s1898_s20, %s1899_s21  }
  0x31   :  { %s1813_s2 = scalar_lea.vmem %s83_s6, 1024  ;;  %p1818_p7 = scmp.lt.s32.totalorder %s83_s6, %s83_s6 }
  0x32   :  { %p1814_p6 = scmp.ne.s32.totalorder %s83_s6, %s1813_s2  ;;  %p1819_p8 = scmp.lt.s32.totalorder %s1813_s2, %s1813_s2 }
  0x34   :  { %p1820_p9 = por %p1819_p8, %p1818_p7 }
  0x36   :  { %p1821_p10 = pnand %p1820_p9, %p1814_p6 }
  0x38   :  { %1824 = shalt.err (!%p1821_p10)
}
  0x39   :  { %88 = dma.hbm_to_vmem [thread:$0]  %s2191_s7, 1024, %s83_s6, [#allocation9], %s1902_s29, %s1902_s29, %s1903_s30  }
  0x3a   :  { %s1906_s26 = smov [#allocation11]  }
  0x3b   :  { %s94_s27 = sshll.u32 %s1906_s26, 4  ;;  %s95_s27 = int_to_ptr.vmem [resolvable:$true] %s94_s27 }
  0x3c   :  { %s1833_s28 = scalar_lea.vmem %s95_s27, 2048  ;;  %p1838_p12 = scmp.lt.s32.totalorder %s95_s27, %s95_s27 }
  0x3d   :  { %p1834_p11 = scmp.ne.s32.totalorder %s95_s27, %s1833_s28  ;;  %p1839_p13 = scmp.lt.s32.totalorder %s1833_s28, %s1833_s28 }
  0x3f   :  { %p1840_p0 = por %p1839_p13, %p1838_p12 }
  0x41   :  { %p1841_p1 = pnand %p1840_p0, %p1834_p11 }
  0x43   :  { %1844 = shalt.err (!%p1841_p1)
}
  0x44   :  { %100 = dma.hbm_to_vmem [thread:$0]  %s2192_s8, 2048, %s95_s27, [#allocation12], %s1898_s20, %s1898_s20, %s1899_s21  }
  0x45   :  { %1885 = dma.done.wait [#allocation3], 1024  }
  0x46   :  { %1886 = vsyncadd [#allocation3], 4294966272 }
  0x47   :  { %1887 = dma.done.wait [#allocation6], 2304  }
  0x48   :  { %1888 = vsyncadd [#allocation6], 4294964992 }
  0x49   :  { %1889 = dma.done.wait [#allocation9], 3072  }
  0x4a   :  { %1890 = vsyncadd [#allocation9], 4294964224 }
  0x4b   :  { %1891 = dma.done.wait [#allocation12], 2048  }
  0x4c   :  { %1892 = vsyncadd [#allocation12], 4294965248  ;;  %v1907_v0 = vmov 0.0   ;;  %v1594_v1 = vld [vmem:[%s2185_s1 + $0x78] sm:$0xff]   ;;  %v1596_v3 = vld [vmem:[%s2185_s1 + $0x70] sm:$0xff]   ;;  %vm1908_vm0 = vmmov 0  }
  0x4d   :  { %1537 = vmatprep.subr.bf16.mxu1 %v1907_v0  ;;  %v1595_v2 = vld [vmem:[%s2185_s1 + $0x38] sm:$0xff]   ;;  %1453 = vmatprep.subr.bf16.mxu0 %v1594_v1  ;;  %v1597_v4 = vld [vmem:[%s2185_s1 + $0x30] sm:$0xff]   ;;  %v1598_v5 = vld [vmem:[%s2185_s1 + $0x68] sm:$0xff]   ;;  %v1909_v59 = vmov 0   ;;  %vm1306_vm1 = vcmask 261120   ;;  %vm780_vm2 = vcmask 130048  }
  0x4e   :  { %1454 = vmatpush3.bf16.msra.mxu0 %v1595_v2  ;;  %v1599_v6 = vld [vmem:[%s2185_s1 + $0x28] sm:$0xff]   ;;  %v1600_v7 = vld [vmem:[%s2185_s1 + $0x60] sm:$0xff]   ;;  %v1602_v9 = vld [vmem:[%s2185_s1 + $0x58] sm:$0xff]   ;;  %1553 = vmatprep.mubr.msk.bf16.mxu1 %vm1908_vm0, %v1907_v0  ;;  %s1910_s19 = smov [#allocation14]  }
  0x4f   :  { %1455 = vmatprep.subr.bf16.mxu0 %v1596_v3  ;;  %v1601_v8 = vld [vmem:[%s2185_s1 + $0x20] sm:$0xff]   ;;  %v1603_v10 = vld [vmem:[%s2185_s1 + $0x18] sm:$0xff]   ;;  %v1604_v11 = vld [vmem:[%s2185_s1 + $0x50] sm:$0xff]   ;;  %s1326_s22 = sshll.u32 %s1910_s19, 4  ;;  %s1327_s22 = int_to_ptr.vmem [resolvable:$true] %s1326_s22 }
  0x50   :  { %v123_v12 = vld [vmem:[%s2184_s0 + $0x8] sm:$0xff]  ;;  %v125_v13 = vld [vmem:[%s2184_s0 + $0x18] sm:$0xff]  ;;  %v1605_v14 = vld [vmem:[%s2185_s1 + $0x10] sm:$0xff]   ;;  %s1845_s23 = scalar_lea.vmem %s1327_s22, 256  ;;  %p1850_p3 = scmp.lt.s32.totalorder %s1327_s22, %s1327_s22 }
  0x51   :  { %v128_v15 = vpack.c.bf16 %v125_v13, %v123_v12  ;;  %v1610_v16 = vld [vmem:[#allocation2 + $0x38] sm:$0xff]   ;;  %v1606_v17 = vld [vmem:[%s2185_s1 + $0x48] sm:$0xff]   ;;  %v1611_v18 = vld [vmem:[#allocation2 + $0x30] sm:$0xff]   ;;  %p1846_p2 = scmp.ne.s32.totalorder %s1327_s22, %s1845_s23  ;;  %p1851_p4 = scmp.lt.s32.totalorder %s1845_s23, %s1845_s23 }
  0x52   :  { %1456 = vmatpush3.bf16.msra.mxu0 %v1597_v4  ;;  %1538 = vmatpush3.bf16.msra.mxu1 %v1610_v16  ;;  %v1607_v19 = vld [vmem:[%s2185_s1 + $0x8] sm:$0xff]   ;;  %v1608_v20 = vld [vmem:[%s2185_s1 + $0x40] sm:$0xff]   ;;  %v124_v24 = vld [vmem:[%s2184_s0 + $0x10] sm:$0xff] }
  0x53   :  { %1457 = vmatprep.subr.bf16.mxu0 %v1598_v5  ;;  %295 = vmatprep.mubr.bf16.mxu0 %v128_v15  ;;  %v1612_v21 = vld [vmem:[#allocation2 + $0x28] sm:$0xff]   ;;  %v1609_v22 = vld [vmem:[%s2185_s1] sm:$0xff]   ;;  %v1614_v27 = vld [vmem:[#allocation2 + $0x18] sm:$0xff]   ;;  %p1852_p5 = por %p1851_p4, %p1850_p3 }
  0x54   :  { %1539 = vmatprep.subr.bf16.mxu1 %v1907_v0  ;;  %v122_v23 = vld [vmem:[%s2184_s0] sm:$0xff]  ;;  %v1615_v28 = vld [vmem:[#allocation2 + $0x10] sm:$0xff]   ;;  %v1616_v29 = vld [vmem:[#allocation2 + $0x8] sm:$0xff]  }
  0x55   :  { %v1613_v25 = vld [vmem:[#allocation2 + $0x20] sm:$0xff]   ;;  %v127_v26 = vpack.c.bf16 %v124_v24, %v122_v23  ;;  %v1618_v31 = vld [vmem:[#allocation5 + $0x70] ss:$8 sps:$4 sm:$0xff]   ;;  %v1620_v32 = vld [vmem:[#allocation5 + $0x74] ss:$8 sps:$4 sm:$0xff]   ;;  %v440_v23 = vlaneseq  ;;  %p1853_p6 = pnand %p1852_p5, %p1846_p2 }
  0x56   :  { %1458 = vmatpush3.bf16.msra.mxu0 %v1599_v6  ;;  %1540 = vmatpush3.bf16.msra.mxu1 %v1611_v18  ;;  %v1617_v30 = vld [vmem:[#allocation2] sm:$0xff]   ;;  %v1626_v35 = vld [vmem:[#allocation5 + $0x54] ss:$8 sps:$4 sm:$0xff]   ;;  %v1624_v36 = vld [vmem:[#allocation5 + $0x50] ss:$8 sps:$4 sm:$0xff]  }
  0x57   :  { %1459 = vmatprep.subr.bf16.mxu0 %v1600_v7  ;;  %1541 = vmatprep.subr.bf16.mxu1 %v1907_v0  ;;  %v1623_v33 = vld [vmem:[#allocation5 + $0x64] ss:$8 sps:$4 sm:$0xff]   ;;  %v1621_v34 = vld [vmem:[#allocation5 + $0x60] ss:$8 sps:$4 sm:$0xff]   ;;  %v1632_v39 = vld [vmem:[#allocation5 + $0x34] ss:$8 sps:$4 sm:$0xff]  }
  0x58   :  { %v1629_v37 = vld [vmem:[#allocation5 + $0x44] ss:$8 sps:$4 sm:$0xff]   ;;  %v1627_v38 = vld [vmem:[#allocation5 + $0x40] ss:$8 sps:$4 sm:$0xff]   ;;  %v1630_v40 = vld [vmem:[#allocation5 + $0x30] ss:$8 sps:$4 sm:$0xff]  }
  0x59   :  { %v1635_v41 = vld [vmem:[#allocation5 + $0x24] ss:$8 sps:$4 sm:$0xff]   ;;  %v1633_v42 = vld [vmem:[#allocation5 + $0x20] ss:$8 sps:$4 sm:$0xff]   ;;  %v1638_v55 = vld [vmem:[#allocation5 + $0x14] ss:$8 sps:$4 sm:$0xff]  }
  0x5a   :  { %1460 = vmatpush3.bf16.msra.mxu0 %v1601_v8  ;;  %1542 = vmatpush3.bf16.msra.mxu1 %v1612_v21  ;;  %v1345_v46 = vld [vmem:[%s2193_s9] ss:$0 sm:$0xff]  ;;  %v1636_v56 = vld [vmem:[#allocation5 + $0x10] ss:$8 sps:$4 sm:$0xff]   ;;  %v1641_v57 = vld [vmem:[#allocation5 + $0x4] ss:$8 sps:$4 sm:$0xff]  }
  0x5b   :  { %1461 = vmatprep.subr.bf16.mxu0 %v1602_v9  ;;  %1543 = vmatprep.subr.bf16.mxu1 %v1907_v0  ;;  %v1639_v58 = vld [vmem:[#allocation5] ss:$8 sps:$4 sm:$0xff]   ;;  %v1642_v60 = vld [vmem:[%s2188_s4 + $0x78] sm:$0xff]   ;;  %v1644_v62 = vld [vmem:[%s2188_s4 + $0x70] sm:$0xff]   ;;  %v441_v24 = vshrl.u32 %v440_v23, 7 }
  0x5c   :  { %v1643_v61 = vld [vmem:[%s2188_s4 + $0x38] sm:$0xff]   ;;  %v1645_v63 = vld [vmem:[%s2188_s4 + $0x30] sm:$0xff]   ;;  %v1646_v1 = vld [vmem:[%s2188_s4 + $0x68] sm:$0xff]  }
  0x5d   :  { %v1647_v2 = vld [vmem:[%s2188_s4 + $0x28] sm:$0xff]   ;;  %v1648_v3 = vld [vmem:[%s2188_s4 + $0x60] sm:$0xff]   ;;  %v1650_v5 = vld [vmem:[%s2188_s4 + $0x58] sm:$0xff]  }
  0x5e   :  { %1462 = vmatpush3.bf16.msra.mxu0 %v1603_v10  ;;  %1544 = vmatpush3.bf16.msra.mxu1 %v1613_v25  ;;  %v1649_v4 = vld [vmem:[%s2188_s4 + $0x20] sm:$0xff]   ;;  %v1651_v6 = vld [vmem:[%s2188_s4 + $0x18] sm:$0xff]   ;;  %v1653_v18 = vld [vmem:[%s2188_s4 + $0x10] sm:$0xff]   ;;  %v2136_v25 = vsub.s32 1, %v441_v24 }
  0x5f   :  { %1463 = vmatprep.subr.bf16.mxu0 %v1604_v11  ;;  %1545 = vmatprep.subr.bf16.mxu1 %v1907_v0  ;;  %v1362_v7 = vld [vmem:[%s2193_s9 + $0x1] ss:$0 sm:$0xff] }
  0x60   :  { %v1656_v21 = vld [vmem:[%s2188_s4 + $0x40] sm:$0xff]  }
  0x62   :  { %1464 = vmatpush3.bf16.msra.mxu0 %v1605_v14  ;;  %1546 = vmatpush3.bf16.msra.mxu1 %v1614_v27  ;;  %v421_v27 = vld [vmem:[%s2193_s9 + $0x2] sm:$0x3] }
  0x63   :  { %1465 = vmatprep.subr.bf16.mxu0 %v1606_v17  ;;  %1547 = vmatprep.subr.bf16.mxu1 %v1907_v0  ;;  %v1652_v17 = vld [vmem:[%s2188_s4 + $0x50] sm:$0xff]  }
  0x66   :  { %1466 = vmatpush3.bf16.msra.mxu0 %v1607_v19  ;;  %1548 = vmatpush3.bf16.msra.mxu1 %v1615_v28  ;;  %v1654_v19 = vld [vmem:[%s2188_s4 + $0x48] sm:$0xff]  }
  0x67   :  { %1467 = vmatprep.subr.bf16.mxu0 %v1608_v20  ;;  %1549 = vmatprep.subr.bf16.mxu1 %v1907_v0  ;;  %v1655_v20 = vld [vmem:[%s2188_s4 + $0x8] sm:$0xff]  }
  0x6a   :  { %1468 = vmatpush3.bf16.msra.mxu0 %v1609_v22  ;;  %1550 = vmatpush3.bf16.msra.mxu1 %v1616_v29  ;;  %v1657_v22 = vld [vmem:[%s2188_s4] sm:$0xff]   ;;  %v447_v29 = vrot.slane %v421_v27, %v2136_v25 }
  0x6b   :  { %1551 = vmatprep.subr.bf16.mxu1 %v1907_v0  ;;  %530 = vmatprep.subr.bf16.mxu0 %v1620_v32 }
  0x6d   :  { %296 = vmatmul.mubr.bf16.vlgmr.msra.gmra.mxu0 %v127_v26  ;;  %v2138_v26 = vsub.s32 0, %v441_v24 }
  0x6e   :  { %1552 = vmatpush3.bf16.msra.mxu1 %v1617_v30  ;;  %531 = vmatpush1.bf16.msra.mxu0 %v1618_v31 }
  0x6f   :  { %532 = vmatprep.subr.bf16.mxu0 %v1623_v33  ;;  %562 = vmatprep.mubr.bf16.mxu0 %v1909_v59  ;;  %v443_v30 = vrot.slane %v421_v27, %v2138_v26 }
  0x70   :  { %1484 = vmatprep.subr.bf16.mxu1 %v1642_v60 }
  0x72   :  { %533 = vmatpush1.bf16.msra.mxu0 %v1621_v34 }
  0x73   :  { %534 = vmatprep.subr.bf16.mxu0 %v1626_v35 }
  0x76   :  { %535 = vmatpush1.bf16.msra.mxu0 %v1624_v36 }
  0x77   :  { %536 = vmatprep.subr.bf16.mxu0 %v1629_v37 }
  0x7a   :  { %537 = vmatpush1.bf16.msra.mxu0 %v1627_v38 }
  0x7b   :  { %538 = vmatprep.subr.bf16.mxu0 %v1632_v39 }
  0x7e   :  { %539 = vmatpush1.bf16.msra.mxu0 %v1630_v40 }
  0x7f   :  { %540 = vmatprep.subr.bf16.mxu0 %v1635_v41 }
  0x82   :  { %541 = vmatpush1.bf16.msra.mxu0 %v1633_v42 }
  0x83   :  { %542 = vmatprep.subr.bf16.mxu0 %v1638_v55  ;;  %v1670_v55 = vld [vmem:[#allocation8 + $0x18] sm:$0xff]  }
  0x86   :  { %543 = vmatpush1.bf16.msra.mxu0 %v1636_v56 }
  0x87   :  { %544 = vmatprep.subr.bf16.mxu0 %v1641_v57  ;;  %v1387_v57 = vld [vmem:[%s2193_s9 + $0x4] ss:$0 sm:$0xff] }
  0x8a   :  { %545 = vmatpush1.bf16.msra.mxu0 %v1639_v58 }
 0x12d   :  { %v1469_v43 = vpop.f32.mrf.mxu0 }
 0x12f   :  { %v1470_v44 = vpop.f32.mrf.mxu0 }
 0x130   :  { %v1471_v45 = vadd.f32 %v1470_v44, %v1469_v43  ;;  %v1658_v44 = vld [vmem:[#allocation7] ss:$8 sps:$4 sm:$0xff]  }
 0x131   :  { %v1472_v47 = vpop.f32.mrf.mxu0 }
 0x132   :  { %v298_v49 = vadd.f32 %v1471_v45, %v1345_v46  ;;  %v1660_v45 = vld [vmem:[#allocation7 + $0x4] ss:$8 sps:$4 sm:$0xff]  }
 0x133   :  { %v1473_v48 = vpop.f32.mrf.mxu0  ;;  %798 = vmatprep.subr.bf16.mxu0 %v1660_v45  ;;  %v1702_v45 = vld [vmem:[#allocation11 + $0x24] ss:$8 sps:$4 sm:$0xff]  }
 0x134   :  { %v1474_v50 = vadd.f32 %v1473_v48, %v1472_v47  ;;  %v304_v52 = vmax.f32 %v298_v49, 0.0  ;;  %v1662_v47 = vld [vmem:[#allocation8 + $0x38] sm:$0xff]   ;;  %v1663_v48 = vld [vmem:[#allocation8 + $0x70] sm:$0xff]  }
 0x135   :  { %v1664_v49 = vld [vmem:[#allocation8 + $0x30] sm:$0xff]  }
 0x136   :  { %v301_v51 = vadd.f32 %v1474_v50, %v1345_v46  ;;  %v1661_v46 = vld [vmem:[#allocation8 + $0x78] sm:$0xff]   ;;  %v1665_v50 = vld [vmem:[#allocation8 + $0x68] sm:$0xff]  }
 0x138   :  { %v305_v53 = vmax.f32 %v301_v51, 0.0  ;;  %v1666_v51 = vld [vmem:[#allocation8 + $0x28] sm:$0xff]  }
 0x13a   :  { %v307_v54 = vpack.c.bf16 %v305_v53, %v304_v52  ;;  %v1667_v52 = vld [vmem:[#allocation8 + $0x60] sm:$0xff]  }
 0x13b   :  { %v1668_v53 = vld [vmem:[#allocation8 + $0x20] sm:$0xff]  }
 0x13c   :  { %1554 = vmatmul.mubr.bf16.vlgmr.msra.gmra.mxu1 %v307_v54  ;;  %v1669_v54 = vld [vmem:[#allocation8 + $0x58] sm:$0xff]  }
 0x13d   :  { %1485 = vmatpush3.bf16.msra.mxu1 %v1643_v61 }
 0x13e   :  { %1486 = vmatprep.subr.bf16.mxu1 %v1644_v62 }
 0x141   :  { %1487 = vmatpush3.bf16.msra.mxu1 %v1645_v63 }
 0x142   :  { %1488 = vmatprep.subr.bf16.mxu1 %v1646_v1 }
 0x145   :  { %1489 = vmatpush3.bf16.msra.mxu1 %v1647_v2 }
 0x146   :  { %1490 = vmatprep.subr.bf16.mxu1 %v1648_v3 }
 0x149   :  { %1491 = vmatpush3.bf16.msra.mxu1 %v1649_v4  ;;  %v1671_v4 = vld [vmem:[#allocation8 + $0x50] sm:$0xff]  }
 0x14a   :  { %1492 = vmatprep.subr.bf16.mxu1 %v1650_v5  ;;  %v1672_v5 = vld [vmem:[#allocation8 + $0x10] sm:$0xff]  }
 0x14d   :  { %1493 = vmatpush3.bf16.msra.mxu1 %v1651_v6  ;;  %v1673_v6 = vld [vmem:[#allocation8 + $0x48] sm:$0xff]  }
 0x14e   :  { %1494 = vmatprep.subr.bf16.mxu1 %v1652_v17 }
 0x151   :  { %1495 = vmatpush3.bf16.msra.mxu1 %v1653_v18 }
 0x152   :  { %1496 = vmatprep.subr.bf16.mxu1 %v1654_v19 }
 0x155   :  { %1497 = vmatpush3.bf16.msra.mxu1 %v1655_v20 }
 0x156   :  { %1498 = vmatprep.subr.bf16.mxu1 %v1656_v21 }
 0x159   :  { %1499 = vmatpush3.bf16.msra.mxu1 %v1657_v22 }
 0x15a   :  { %1506 = vmatprep.subr.bf16.mxu1 %v1661_v46  ;;  %v1700_v46 = vld [vmem:[#allocation11 + $0x20] ss:$8 sps:$4 sm:$0xff]  }
 0x1fc   :  { %v412_v8 = vpop.f32.mrf.mxu1 }
 0x1fd   :  { %v413_v10 = vadd.f32 %v1362_v7, %v412_v8  ;;  %v1675_v8 = vld [vmem:[#allocation8 + $0x40] sm:$0xff]  }
 0x1fe   :  { %v1555_v9 = vpop.f32.mrf.mxu1 }
 0x1ff   :  { %v419_v14 = vmax.f32 %v413_v10, 0.0  ;;  %v1676_v9 = vld [vmem:[#allocation8] sm:$0xff]   ;;  %v1677_v10 = vld [vmem:[#allocation10 + $0x38] sm:$0xff]  }
 0x200   :  { %v415_v11 = vpop.f32.mrf.mxu1 }
 0x201   :  { %v416_v12 = vadd.f32 %v1362_v7, %v415_v11  ;;  %v1674_v7 = vld [vmem:[#allocation8 + $0x8] sm:$0xff]   ;;  %v1678_v11 = vld [vmem:[#allocation10 + $0x30] sm:$0xff]  }
 0x202   :  { %v1556_v13 = vpop.f32.mrf.mxu1 }
 0x203   :  { %v420_v15 = vmax.f32 %v416_v12, 0.0  ;;  %v1679_v12 = vld [vmem:[#allocation10 + $0x28] sm:$0xff]   ;;  %v1680_v13 = vld [vmem:[#allocation10 + $0x20] sm:$0xff]  }
 0x205   :  { %v422_v16 = vpack.c.bf16 %v420_v15, %v419_v14  ;;  %v755_v14 = vld [vmem:[%s2193_s9 + $0x5] sm:$0x3] }
 0x206   :  { %v763_v17 = vrot.slane %v755_v14, %v2138_v26 }
 0x207   :  { %563 = vmatmul.mubr.bf16.vlgmr.msra.gmra.mxu0 %v422_v16  ;;  %v767_v16 = vrot.slane %v755_v14, %v2136_v25 }
 0x208   :  { %816 = vmatprep.mubr.bf16.mxu0 %v1909_v59  ;;  %799 = vmatpush1.bf16.msra.mxu0 %v1658_v44  ;;  %v1699_v44 = vld [vmem:[#allocation11 + $0x34] ss:$8 sps:$4 sm:$0xff]  }
 0x209   :  { %1557 = vmatprep.subr.bf16.mxu0 %v1907_v0 }
 0x2c7   :  { %v564_v28 = vpop.f32.mrf.mxu0 }
 0x2c8   :  { %v565_v35 = vadd.f32 %v564_v28, %v443_v30 }
 0x2c9   :  { %v566_v31 = vpop.f32.mrf.mxu0 }
 0x2ca   :  { %v567_v33 = vadd.f32 %v566_v31, %v447_v29  ;;  %v573_v41 = vmax.f32 %v565_v35, 0.0  ;;  %v1683_v35 = vld [vmem:[#allocation10 + $0x8] sm:$0xff]  }
 0x2cb   :  { %v568_v32 = vpop.f32.mrf.mxu0 }
 0x2cc   :  { %v569_v34 = vadd.f32 %v568_v32, %v443_v30  ;;  %v574_v39 = vmax.f32 %v567_v33, 0.0  ;;  %v1681_v33 = vld [vmem:[#allocation10 + $0x18] sm:$0xff]  }
 0x2cd   :  { %v570_v36 = vpop.f32.mrf.mxu0 }
 0x2ce   :  { %v571_v37 = vadd.f32 %v570_v36, %v447_v29  ;;  %v575_v38 = vmax.f32 %v569_v34, 0.0  ;;  %v1682_v34 = vld [vmem:[#allocation10 + $0x10] sm:$0xff]   ;;  %v1684_v36 = vld [vmem:[#allocation10] sm:$0xff]  }
 0x2d0   :  { %v576_v40 = vmax.f32 %v571_v37, 0.0  ;;  %v578_v43 = vpack.c.bf16 %v575_v38, %v573_v41  ;;  %v1685_v37 = vld [vmem:[#allocation11 + $0x70] ss:$8 sps:$4 sm:$0xff]   ;;  %v1687_v38 = vld [vmem:[#allocation11 + $0x74] ss:$8 sps:$4 sm:$0xff]  }
 0x2d1   :  { %v1691_v41 = vld [vmem:[#allocation11 + $0x50] ss:$8 sps:$4 sm:$0xff]  }
 0x2d2   :  { %v579_v42 = vpack.c.bf16 %v576_v40, %v574_v39  ;;  %v1690_v39 = vld [vmem:[#allocation11 + $0x64] ss:$8 sps:$4 sm:$0xff]   ;;  %v1693_v40 = vld [vmem:[#allocation11 + $0x54] ss:$8 sps:$4 sm:$0xff]  }
 0x2d4   :  { %746 = vmatprep.mubr.bf16.mxu1 %v579_v42  ;;  %v1696_v42 = vld [vmem:[#allocation11 + $0x44] ss:$8 sps:$4 sm:$0xff]  }
 0x2d5   :  { %747 = vmatmul.mubr.bf16.vlgmr.msra.gmra.mxu1 %v578_v43  ;;  %v1694_v43 = vld [vmem:[#allocation11 + $0x40] ss:$8 sps:$4 sm:$0xff]  }
 0x2d6   :  { %1507 = vmatpush3.bf16.msra.mxu1 %v1662_v47 }
 0x2d7   :  { %1508 = vmatprep.subr.bf16.mxu1 %v1663_v48 }
 0x2da   :  { %1509 = vmatpush3.bf16.msra.mxu1 %v1664_v49 }
 0x2db   :  { %1510 = vmatprep.subr.bf16.mxu1 %v1665_v50  ;;  %v1407_v50 = vld [vmem:[%s2193_s9 + $0x7] ss:$0 sm:$0xff] }
 0x2de   :  { %1511 = vmatpush3.bf16.msra.mxu1 %v1666_v51 }
 0x2df   :  { %1512 = vmatprep.subr.bf16.mxu1 %v1667_v52 }
 0x2e2   :  { %1513 = vmatpush3.bf16.msra.mxu1 %v1668_v53 }
 0x2e3   :  { %1514 = vmatprep.subr.bf16.mxu1 %v1669_v54 }
 0x2e6   :  { %1515 = vmatpush3.bf16.msra.mxu1 %v1670_v55 }
 0x2e7   :  { %1516 = vmatprep.subr.bf16.mxu1 %v1671_v4 }
 0x2ea   :  { %1517 = vmatpush3.bf16.msra.mxu1 %v1672_v5 }
 0x2eb   :  { %1518 = vmatprep.subr.bf16.mxu1 %v1673_v6 }
 0x2ee   :  { %1519 = vmatpush3.bf16.msra.mxu1 %v1674_v7 }
 0x2ef   :  { %1520 = vmatprep.subr.bf16.mxu1 %v1675_v8 }
 0x2f2   :  { %1521 = vmatpush3.bf16.msra.mxu1 %v1676_v9 }
 0x2f3   :  { %1235 = vmatprep.subr.bf16.mxu1 %v1687_v38 }
 0x395   :  { %v1500_v56 = vpop.f32.mrf.mxu1 }
 0x397   :  { %v1501_v58 = vpop.f32.mrf.mxu1 }
 0x398   :  { %v1502_v60 = vadd.f32 %v1501_v58, %v1500_v56 }
 0x399   :  { %v1503_v61 = vpop.f32.mrf.mxu1 }
 0x39a   :  { %v749_v62 = vadd.f32 %v1502_v60, %v1387_v57  ;;  %v1705_v60 = vld [vmem:[#allocation11 + $0x14] ss:$8 sps:$4 sm:$0xff]  }
 0x39b   :  { %v1504_v63 = vpop.f32.mrf.mxu1 }
 0x39c   :  { %v1505_v1 = vadd.f32 %v1504_v63, %v1503_v61  ;;  %1307 = vst.msk [vmem:[#allocation14] sm:$0xff] %vm1306_vm1, %v749_v62  ;;  %v1703_v61 = vld [vmem:[#allocation11 + $0x10] ss:$8 sps:$4 sm:$0xff]   ;;  %v1706_v63 = vld [vmem:[#allocation11] ss:$8 sps:$4 sm:$0xff]  }
 0x39e   :  { %v752_v2 = vadd.f32 %v1505_v1, %v1387_v57  ;;  %v1424_v1 = vld [vmem:[%s2193_s9 + $0x8] ss:$0 sm:$0xff] }
 0x3a0   :  { %v756_v3 = vpack.c.bf16 %v752_v2, %v749_v62  ;;  %1308 = vst.msk [vmem:[#allocation14 + $0x8] sm:$0xff] %vm1306_vm1, %v752_v2  ;;  %v1708_v62 = vld [vmem:[#allocation11 + $0x4] ss:$8 sps:$4 sm:$0xff]  }
 0x3a2   :  { %1406 = vmatmul.mubr.msk.bf16.vlgmr.msra.gmra.mxu0 %vm780_vm2, %v756_v3 }
 0x3a3   :  { %1573 = vmatprep.mubr.msk.bf16.mxu0 %vm1908_vm0, %v1907_v0  ;;  %1558 = vmatpush3.bf16.msra.mxu0 %v1677_v10 }
 0x3a4   :  { %1559 = vmatprep.subr.bf16.mxu0 %v1907_v0 }
 0x3a7   :  { %1560 = vmatpush3.bf16.msra.mxu0 %v1678_v11 }
 0x3a8   :  { %1561 = vmatprep.subr.bf16.mxu0 %v1907_v0 }
 0x3ab   :  { %1562 = vmatpush3.bf16.msra.mxu0 %v1679_v12 }
 0x3ac   :  { %1563 = vmatprep.subr.bf16.mxu0 %v1907_v0 }
 0x3af   :  { %1564 = vmatpush3.bf16.msra.mxu0 %v1680_v13 }
 0x3b0   :  { %1565 = vmatprep.subr.bf16.mxu0 %v1907_v0 }
 0x3b3   :  { %1566 = vmatpush3.bf16.msra.mxu0 %v1681_v33 }
 0x3b4   :  { %1567 = vmatprep.subr.bf16.mxu0 %v1907_v0 }
 0x3b7   :  { %1568 = vmatpush3.bf16.msra.mxu0 %v1682_v34 }
 0x3b8   :  { %1569 = vmatprep.subr.bf16.mxu0 %v1907_v0 }
 0x3bb   :  { %1570 = vmatpush3.bf16.msra.mxu0 %v1683_v35 }
 0x3bc   :  { %1571 = vmatprep.subr.bf16.mxu0 %v1907_v0  ;;  %v1697_v0 = vld [vmem:[#allocation11 + $0x30] ss:$8 sps:$4 sm:$0xff]  }
 0x3bf   :  { %1572 = vmatpush3.bf16.msra.mxu0 %v1684_v36 }
 0x462   :  { %v818_v15 = vpop.f32.mrf.mxu0 }
 0x463   :  { %v819_v22 = vadd.f32 %v818_v15, %v763_v17 }
 0x464   :  { %v820_v18 = vpop.f32.mrf.mxu0 }
 0x465   :  { %v821_v20 = vadd.f32 %v820_v18, %v767_v16  ;;  %v827_v30 = vmax.f32 %v819_v22, 0.0 }
 0x466   :  { %v822_v19 = vpop.f32.mrf.mxu0 }
 0x467   :  { %v823_v21 = vadd.f32 %v822_v19, %v763_v17  ;;  %v828_v28 = vmax.f32 %v821_v20, 0.0 }
 0x468   :  { %v824_v23 = vpop.f32.mrf.mxu0 }
 0x469   :  { %v825_v24 = vadd.f32 %v824_v23, %v767_v16  ;;  %v829_v27 = vmax.f32 %v823_v21, 0.0 }
 0x46b   :  { %v830_v29 = vmax.f32 %v825_v24, 0.0  ;;  %v832_v32 = vpack.c.bf16 %v829_v27, %v827_v30 }
 0x46d   :  { %v833_v31 = vpack.c.bf16 %v830_v29, %v828_v28 }
 0x46f   :  { %1000 = vmatprep.mubr.bf16.mxu1 %v833_v31 }
 0x470   :  { %1001 = vmatmul.mubr.bf16.vlgmr.msra.gmra.mxu1 %v832_v32 }
 0x471   :  { %1267 = vmatprep.mubr.bf16.mxu1 %v1909_v59  ;;  %1236 = vmatpush1.bf16.msra.mxu1 %v1685_v37  ;;  %v1688_v59 = vld [vmem:[#allocation11 + $0x60] ss:$8 sps:$4 sm:$0xff]  }
 0x472   :  { %1237 = vmatprep.subr.bf16.mxu1 %v1690_v39 }
 0x475   :  { %1238 = vmatpush1.bf16.msra.mxu1 %v1688_v59 }
 0x476   :  { %1239 = vmatprep.subr.bf16.mxu1 %v1693_v40 }
 0x479   :  { %1240 = vmatpush1.bf16.msra.mxu1 %v1691_v41 }
 0x47a   :  { %1241 = vmatprep.subr.bf16.mxu1 %v1696_v42 }
 0x47d   :  { %1242 = vmatpush1.bf16.msra.mxu1 %v1694_v43 }
 0x47e   :  { %1243 = vmatprep.subr.bf16.mxu1 %v1699_v44 }
 0x481   :  { %1244 = vmatpush1.bf16.msra.mxu1 %v1697_v0 }
 0x482   :  { %1245 = vmatprep.subr.bf16.mxu1 %v1702_v45 }
 0x485   :  { %1246 = vmatpush1.bf16.msra.mxu1 %v1700_v46 }
 0x486   :  { %1247 = vmatprep.subr.bf16.mxu1 %v1705_v60 }
 0x489   :  { %1248 = vmatpush1.bf16.msra.mxu1 %v1703_v61 }
 0x48a   :  { %1249 = vmatprep.subr.bf16.mxu1 %v1708_v62 }
 0x48d   :  { %1250 = vmatpush1.bf16.msra.mxu1 %v1706_v63 }
 0x530   :  { %v1522_v47 = vpop.f32.mrf.mxu1 }
 0x532   :  { %v1523_v48 = vpop.f32.mrf.mxu1 }
 0x533   :  { %v1524_v49 = vadd.f32 %v1523_v48, %v1522_v47 }
 0x534   :  { %v1525_v51 = vpop.f32.mrf.mxu1 }
 0x535   :  { %v1003_v53 = vadd.f32 %v1524_v49, %v1407_v50 }
 0x536   :  { %v1526_v52 = vpop.f32.mrf.mxu1 }
 0x537   :  { %v1527_v54 = vadd.f32 %v1526_v52, %v1525_v51  ;;  %v1009_v56 = vmax.f32 %v1003_v53, 0.0 }
 0x539   :  { %v1006_v55 = vadd.f32 %v1527_v54, %v1407_v50 }
 0x53b   :  { %v1010_v57 = vmax.f32 %v1006_v55, 0.0 }
 0x53d   :  { %v1012_v58 = vpack.c.bf16 %v1010_v57, %v1009_v56 }
 0x53f   :  { %1574 = vmatmul.mubr.bf16.vlgmr.msra.gmra.mxu0 %v1012_v58 }
 0x5ff   :  { %v1117_v2 = vpop.f32.mrf.mxu0 }
 0x600   :  { %v1118_v4 = vadd.f32 %v1424_v1, %v1117_v2 }
 0x601   :  { %v1575_v3 = vpop.f32.mrf.mxu0 }
 0x602   :  { %v1124_v8 = vmax.f32 %v1118_v4, 0.0 }
 0x603   :  { %v1120_v5 = vpop.f32.mrf.mxu0 }
 0x604   :  { %v1121_v6 = vadd.f32 %v1424_v1, %v1120_v5 }
 0x605   :  { %v1576_v7 = vpop.f32.mrf.mxu0 }
 0x606   :  { %v1125_v9 = vmax.f32 %v1121_v6, 0.0 }
 0x608   :  { %v1127_v10 = vpack.c.bf16 %v1125_v9, %v1124_v8 }
 0x60a   :  { %1268 = vmatmul.mubr.bf16.vlgmr.msra.gmra.mxu1 %v1127_v10 }
 0x60b   :  { %1856 = shalt.err (!%p1853_p6)
}
 0x60c   :  { %1332 = dma.vmem_to_hbm [thread:$0]  %s1327_s22, 256, %s2195_s11, [#allocation15], %s1898_s20, %s1898_s20, %s1899_s21  }
 0x60d   :  { %v1126_v11 = vld [vmem:[%s2193_s9 + $0x9] sm:$0x3]  ;;  %s1911_s9 = smov [#allocation13]  }
 0x60e   :  { %v1148_v12 = vrot.slane %v1126_v11, %v2138_v26  ;;  %v1152_v13 = vrot.slane %v1126_v11, %v2136_v25  ;;  %s1314_s11 = sshll.u32 %s1911_s9, 4  ;;  %s1315_s11 = int_to_ptr.vmem [resolvable:$true] %s1314_s11 }
 0x60f   :  { %s1865_s20 = scalar_lea.vmem %s1315_s11, 512  ;;  %p1870_p8 = scmp.lt.s32.totalorder %s1315_s11, %s1315_s11 }
 0x610   :  { %p1866_p7 = scmp.ne.s32.totalorder %s1315_s11, %s1865_s20  ;;  %p1871_p9 = scmp.lt.s32.totalorder %s1865_s20, %s1865_s20 }
 0x612   :  { %p1872_p10 = por %p1871_p9, %p1870_p8 }
 0x614   :  { %p1873_p11 = pnand %p1872_p10, %p1866_p7 }
 0x6ca   :  { %v1269_v14 = vpop.f32.mrf.mxu1 }
 0x6cb   :  { %v1270_v15 = vadd.f32 %v1269_v14, %v1148_v12 }
 0x6cc   :  { %v1271_v16 = vpop.f32.mrf.mxu1 }
 0x6cd   :  { %v1449_v17 = vmul.f32 -1.442695, %v1270_v15  ;;  %v1272_v18 = vadd.f32 %v1271_v16, %v1152_v13 }
 0x6ce   :  { %v1273_v19 = vpop.f32.mrf.mxu1 }
 0x6cf   :  { %1709 = vpow2.f32 %v1449_v17  ;;  %v1450_v20 = vmul.f32 -1.442695, %v1272_v18  ;;  %v1274_v21 = vadd.f32 %v1273_v19, %v1148_v12 }
 0x6d0   :  { %v1275_v22 = vpop.f32.mrf.mxu1 }
 0x6d1   :  { %1711 = vpow2.f32 %v1450_v20  ;;  %v1451_v23 = vmul.f32 -1.442695, %v1274_v21  ;;  %v1276_v24 = vadd.f32 %v1275_v22, %v1152_v13 }
 0x6d3   :  { %1713 = vpow2.f32 %v1451_v23  ;;  %v1452_v27 = vmul.f32 -1.442695, %v1276_v24 }
 0x6d5   :  { %1715 = vpow2.f32 %v1452_v27 }
 0x6dc   :  { %v1710_v28 = vpop.eup %1709 }
 0x6dd   :  { %v1290_v26 = vadd.f32 1.0, %v1710_v28 }
 0x6de   :  { %v1712_v29 = vpop.eup %1711 }
 0x6df   :  { %1717 = vrcp.f32 %v1290_v26  ;;  %v1291_v25 = vadd.f32 1.0, %v1712_v29 }
 0x6e0   :  { %v1714_v30 = vpop.eup %1713 }
 0x6e1   :  { %1719 = vrcp.f32 %v1291_v25  ;;  %v1292_v31 = vadd.f32 1.0, %v1714_v30 }
 0x6e2   :  { %v1716_v32 = vpop.eup %1715 }
 0x6e3   :  { %1721 = vrcp.f32 %v1292_v31  ;;  %v1293_v33 = vadd.f32 1.0, %v1716_v32 }
 0x6e5   :  { %1723 = vrcp.f32 %v1293_v33 }
 0x6ec   :  { %v1718_v34 = vpop.eup %1717 }
 0x6ed   :  { %1302 = vst [vmem:[#allocation13] sm:$0xff] %v1718_v34 }
 0x6ee   :  { %v1720_v35 = vpop.eup %1719 }
 0x6ef   :  { %1303 = vst [vmem:[#allocation13 + $0x8] sm:$0xff] %v1720_v35 }
 0x6f0   :  { %v1722_v36 = vpop.eup %1721 }
 0x6f1   :  { %1304 = vst [vmem:[#allocation13 + $0x10] sm:$0xff] %v1722_v36 }
 0x6f2   :  { %v1724_v37 = vpop.eup %1723 }
 0x6f3   :  { %1305 = vst [vmem:[#allocation13 + $0x18] sm:$0xff] %v1724_v37 }
 0x6f4   :  { %1876 = shalt.err (!%p1873_p11)
}
 0x6f5   :  { %s1912_s21 = smov 256   ;;  %s1913_s25 = smov 16  }
 0x6f6   :  { %1320 = dma.vmem_to_hbm [thread:$0]  %s1315_s11, 512, %s2194_s10, [#allocation4], %s1912_s21, %s1912_s21, %s1913_s25  }
 0x6f7   :  { %1893 = dma.done.wait [#allocation4], 512  }
 0x6f8   :  { %1894 = vsyncadd [#allocation4], 4294966784 }
 0x6f9   :  { %1895 = dma.done.wait [#allocation15], 256  }
 0x6fa   :  { %1896 = vsyncadd [#allocation15], 4294967040 }
 0x6fb   :  { %1339 = vsyncpa [#allocation3], 1 }
 0x6fc   :  { %1340 = vsyncpa [#allocation6], 1 }
 0x6fd   :  { %1341 = vsyncpa [#allocation9], 1 }
 0x6fe   :  { %1342 = vsyncpa [#allocation12], 1 }
 0x6ff   :  { %1343 = vsyncpa [#allocation4], 1 }
 0x700   :  { %1344 = vsyncpa [#allocation15], 1 }

</bundles_post_ra>
